<compile_context>
chip_gen: v7x
topology: tpu7x:2x2x1
jax: 0.10.0
libtpu: 0.0.40
codegen_flags: <defaults>
</compile_context>

<pallas_src>
import functools

import jax
import jax.numpy as jnp
from jax.experimental import pallas as pl
from jax.experimental.pallas import tpu as pltpu


def _round_up(x, m):
    return ((x + m - 1) // m) * m


def _cdiv(a, b):
    return (a + b - 1) // b


def _mapping_kernel(x_ref, w1_ref, b1_ref, w2_ref, b2_ref, w3_ref, b3_ref,
                    o_ref):
    """Fused Linear->ReLU->Linear->ReLU->Linear over one batch tile."""
    mm_dtype = w1_ref.dtype  # MXU operand dtype (float32 or bfloat16)

    # x arrives already cast to mm_dtype (done once in the wrapper).
    x = x_ref[...]

    # Linear 1 + ReLU  (MXU matmul, f32 accumulation; bias/ReLU in f32 on VPU)
    h1 = jnp.dot(x, w1_ref[...], preferred_element_type=jnp.float32)
    h1 = jnp.maximum(h1 + b1_ref[...], 0.0)

    # Linear 2 + ReLU
    h1m = h1 if h1.dtype == mm_dtype else h1.astype(mm_dtype)
    h2 = jnp.dot(h1m, w2_ref[...], preferred_element_type=jnp.float32)
    h2 = jnp.maximum(h2 + b2_ref[...], 0.0)

    # Linear 3 (no activation).
    h2m = h2 if h2.dtype == mm_dtype else h2.astype(mm_dtype)
    out = jnp.dot(h2m, w3_ref[...], preferred_element_type=jnp.float32)
    o_ref[...] = (out + b3_ref[...]).astype(o_ref.dtype)


def prepare_mapping_params(params, *, mm_dtype=jnp.bfloat16, lane=128):
    """One-time conversion of PyTorch-convention params to kernel layout.

    params: w1 (h,z), b1 (h,), w2 (h,h), b2 (h,), w3 (w,h), b3 (w,)
    Weights are transposed to (in, out) and cast to the MXU operand dtype
    (bf16 by default: single MXU pass per layer with f32 accumulation).
    Biases stay f32 as (1, dim) rows.  The last layer is zero-padded along the
    output dim to a multiple of `lane` only when w_dim > lane; for small w_dim
    the masked store writes fewer HBM bytes than a lane-dense padded store.
    """
    hidden_dim = params["w1"].shape[0]
    w_dim = params["w3"].shape[0]
    w_pad = _round_up(w_dim, lane) if w_dim > lane else w_dim

    w1t = params["w1"].T.astype(mm_dtype)                     # (z, h)
    w2t = params["w2"].T.astype(mm_dtype)                     # (h, h)
    w3t = params["w3"].T                                      # (h, w)
    b3 = params["b3"]
    if w_pad != w_dim:
        w3t = jnp.pad(w3t, ((0, 0), (0, w_pad - w_dim)))
        b3 = jnp.pad(b3, (0, w_pad - w_dim))
    w3t = w3t.astype(mm_dtype)                                # (h, w_pad)

    b1 = params["b1"].reshape(1, hidden_dim).astype(jnp.float32)
    b2 = params["b2"].reshape(1, hidden_dim).astype(jnp.float32)
    b3 = b3.reshape(1, w_pad).astype(jnp.float32)

    return {"w1t": w1t, "b1": b1, "w2t": w2t, "b2": b2, "w3t": w3t, "b3": b3}


def _select_batch_tiling(n, tile_n_pref):
    """Pick (tile_n, num_tiles) minimizing batch padding.

    * tile_n is a multiple of 8 sublanes.
    * num_tiles >= 2 whenever n > 8 so the "parallel" batch axis shards across
      both v7x TensorCores (neutral on single-TC v5e/v6e).
    """
    n8 = _round_up(max(n, 1), 8)
    if n8 <= 8:
        return 8, 1
    num_tiles = max(2, _cdiv(n8, max(8, tile_n_pref)))
    tile_n = _round_up(_cdiv(n8, num_tiles), 8)
    return tile_n, num_tiles


@functools.partial(jax.jit, static_argnames=("w_dim", "tile_n"))
def mapping_layers_forward(noise, kparams, *, w_dim, tile_n=512):
    """Pallas forward pass of MappingLayers.

    noise:   (N, z_dim) float32
    kparams: output of prepare_mapping_params
    w_dim:   true (unpadded) output feature dim
    tile_n:  preferred batch tile (rows); actual tile is chosen to minimize
             padding while keeping grid >= 2 for n > 8.
    """
    n, z_dim = noise.shape
    w1t, b1 = kparams["w1t"], kparams["b1"]
    w2t, b2 = kparams["w2t"], kparams["b2"]
    w3t, b3 = kparams["w3t"], kparams["b3"]
    mm_dtype = w1t.dtype
    hidden_dim = w1t.shape[1]
    w_out = w3t.shape[1]          # possibly lane-padded
    out_dtype = noise.dtype

    tn, num_tiles = _select_batch_tiling(n, tile_n)
    n_pad = tn * num_tiles

    # Cast x to the MXU operand dtype once here (halves x DMA bytes on the
    # bf16 path) and fold it into the batch pad; no per-tile cast in-kernel.
    x = noise.astype(mm_dtype) if noise.dtype != mm_dtype else noise
    if n_pad != n:
        x = jnp.pad(x, ((0, n_pad - n), (0, 0)))

    # Weights/biases have constant index maps -> single-buffer them.
    single = dict(pipeline_mode=pl.Buffered(1))

    flops = 2 * n_pad * (z_dim * hidden_dim
                         + hidden_dim * hidden_dim
                         + hidden_dim * w_out)
    bytes_accessed = (
        n_pad * z_dim * jnp.dtype(mm_dtype).itemsize
        + n_pad * w_out * jnp.dtype(out_dtype).itemsize
        + sum(int(a.size) * jnp.dtype(a.dtype).itemsize
              for a in (w1t, b1, w2t, b2, w3t, b3)))

    out = pl.pallas_call(
        _mapping_kernel,
        out_shape=jax.ShapeDtypeStruct((n_pad, w_out), out_dtype),
        grid_spec=pltpu.PrefetchScalarGridSpec(
            num_scalar_prefetch=0,
            grid=(num_tiles,),
            in_specs=[
                pl.BlockSpec((tn, z_dim), lambda i: (i, 0)),                        # x tile
                pl.BlockSpec((z_dim, hidden_dim), lambda i: (0, 0), **single),      # W1^T
                pl.BlockSpec((1, hidden_dim), lambda i: (0, 0), **single),          # b1
                pl.BlockSpec((hidden_dim, hidden_dim), lambda i: (0, 0), **single), # W2^T
                pl.BlockSpec((1, hidden_dim), lambda i: (0, 0), **single),          # b2
                pl.BlockSpec((hidden_dim, w_out), lambda i: (0, 0), **single),      # W3^T
                pl.BlockSpec((1, w_out), lambda i: (0, 0), **single),               # b3
            ],
            out_specs=pl.BlockSpec((tn, w_out), lambda i: (i, 0)),
        ),
        compiler_params=pltpu.CompilerParams(
            dimension_semantics=("parallel",)),
        cost_estimate=pl.CostEstimate(
            flops=flops, transcendentals=0, bytes_accessed=bytes_accessed),
    )(x, w1t, b1, w2t, b2, w3t, b3)

    # Strip batch / lane padding (no-op slice avoided when nothing was padded).
    if n_pad != n or w_out != w_dim:
        out = out[:n, :w_dim]
    return out


def _init_params(key, z_dim, hidden_dim, w_dim):
    """Deterministic parameter init (PyTorch nn.Linear shapes / init scheme)."""
    ks = jax.random.split(key, 6)

    def lin(kw, kb, out_d, in_d):
        bound = 1.0 / jnp.sqrt(in_d)
        w = jax.random.uniform(kw, (out_d, in_d), jnp.float32, -bound, bound)
        b = jax.random.uniform(kb, (out_d,), jnp.float32, -bound, bound)
        return w, b

    w1, b1 = lin(ks[0], ks[1], hidden_dim, z_dim)
    w2, b2 = lin(ks[2], ks[3], hidden_dim, hidden_dim)
    w3, b3 = lin(ks[4], ks[5], w_dim, hidden_dim)
    return {"w1": w1, "b1": b1, "w2": w2, "b2": b2, "w3": w3, "b3": b3}


def _reference_forward(noise, p):
    h = jnp.maximum(noise @ p["w1"].T + p["b1"], 0.0)
    h = jnp.maximum(h @ p["w2"].T + p["b2"], 0.0)
    return h @ p["w3"].T + p["b3"]


if __name__ == "__main__":
    z_dim, hidden_dim, w_dim = 16, 32, 24
    n_samples = 300  # not a tile multiple -> exercises minimal-padding tiling

    key = jax.random.PRNGKey(0)
    k_noise, k_params = jax.random.split(key)
    noise = jax.random.normal(k_noise, (n_samples, z_dim), jnp.float32)
    params = _init_params(k_params, z_dim, hidden_dim, w_dim)
    ref = _reference_forward(noise, params)

    # Default path: bf16 MXU operands (single MXU pass per layer on all TPU
    # generations), f32 accumulation + f32 bias/ReLU, f32 output.
    kp = prepare_mapping_params(params)
    out = jax.block_until_ready(mapping_layers_forward(noise, kp, w_dim=w_dim))
    assert out.shape == (n_samples, w_dim)
    assert jnp.allclose(out, ref, atol=5e-2, rtol=5e-2), "bf16 mismatch vs reference"

    # f32 MXU operand path: bit-faithful to the module's semantics.
    kp_f32 = prepare_mapping_params(params, mm_dtype=jnp.float32)
    out_f32 = jax.block_until_ready(
        mapping_layers_forward(noise, kp_f32, w_dim=w_dim))
    assert out_f32.shape == (n_samples, w_dim)
    assert jnp.allclose(out_f32, ref, atol=1e-5, rtol=1e-5), "f32 mismatch vs reference"

    print("KERNEL_OK")
</pallas_src>

<mosaic_0001>
module attributes {stable_mosaic.version = 11 : i64} {
  func.func @_mapping_kernel(%arg0: i32, %arg1: memref<152x16xbf16, #tpu.memory_space<vmem>>, %arg2: memref<16x32xbf16, #tpu.memory_space<vmem>>, %arg3: memref<1x32xf32, #tpu.memory_space<vmem>>, %arg4: memref<32x32xbf16, #tpu.memory_space<vmem>>, %arg5: memref<1x32xf32, #tpu.memory_space<vmem>>, %arg6: memref<32x24xbf16, #tpu.memory_space<vmem>>, %arg7: memref<1x24xf32, #tpu.memory_space<vmem>>, %arg8: memref<152x24xf32, #tpu.memory_space<vmem>>) attributes {dimension_semantics = [#tpu.dimension_semantics<parallel>], iteration_bounds = array<i64: 2>, scalar_prefetch = 0 : i64, scratch_operands = 0 : i64, tpu.core_type = #tpu.core_type<tc>, window_params = [{transform_indices = @transform_0, window_bounds = array<i64: 152, 16>}, {pipeline_mode = #tpu.pipeline_mode<synchronous>, transform_indices = @transform_1, window_bounds = array<i64: 16, 32>}, {pipeline_mode = #tpu.pipeline_mode<synchronous>, transform_indices = @transform_2, window_bounds = array<i64: 1, 32>}, {pipeline_mode = #tpu.pipeline_mode<synchronous>, transform_indices = @transform_3, window_bounds = array<i64: 32, 32>}, {pipeline_mode = #tpu.pipeline_mode<synchronous>, transform_indices = @transform_4, window_bounds = array<i64: 1, 32>}, {pipeline_mode = #tpu.pipeline_mode<synchronous>, transform_indices = @transform_5, window_bounds = array<i64: 32, 24>}, {pipeline_mode = #tpu.pipeline_mode<synchronous>, transform_indices = @transform_6, window_bounds = array<i64: 1, 24>}, {transform_indices = @transform_7, window_bounds = array<i64: 152, 24>}]} {
    %c0 = arith.constant 0 : index
    %c0_0 = arith.constant 0 : index
    %0 = vector.load %arg1[%c0, %c0_0] : memref<152x16xbf16, #tpu.memory_space<vmem>>, vector<152x16xbf16>
    %c0_1 = arith.constant 0 : index
    %c0_2 = arith.constant 0 : index
    %1 = vector.load %arg2[%c0_1, %c0_2] : memref<16x32xbf16, #tpu.memory_space<vmem>>, vector<16x32xbf16>
    %cst = arith.constant dense<0.000000e+00> : vector<152x32xf32>
    %2 = tpu.matmul %0, %1, %cst {dimension_numbers = #tpu.dot_dimension_numbers<[1], [0], [0], [1], [0, 0, 1, 1], [], []>} : vector<152x16xbf16>, vector<16x32xbf16>, vector<152x32xf32> -> vector<152x32xf32>
    %c0_3 = arith.constant 0 : index
    %c0_4 = arith.constant 0 : index
    %3 = vector.load %arg3[%c0_3, %c0_4] : memref<1x32xf32, #tpu.memory_space<vmem>>, vector<1x32xf32>
    %4 = vector.broadcast %3 : vector<1x32xf32> to vector<152x32xf32>
    %5 = arith.addf %2, %4 : vector<152x32xf32>
    %cst_5 = arith.constant 0.000000e+00 : f32
    %6 = vector.broadcast %cst_5 : f32 to vector<152x32xf32>
    %7 = arith.maximumf %5, %6 : vector<152x32xf32>
    %8 = arith.truncf %7 : vector<152x32xf32> to vector<152x32xbf16>
    %c0_6 = arith.constant 0 : index
    %c0_7 = arith.constant 0 : index
    %9 = vector.load %arg4[%c0_6, %c0_7] : memref<32x32xbf16, #tpu.memory_space<vmem>>, vector<32x32xbf16>
    %cst_8 = arith.constant dense<0.000000e+00> : vector<152x32xf32>
    %10 = tpu.matmul %8, %9, %cst_8 {dimension_numbers = #tpu.dot_dimension_numbers<[1], [0], [0], [1], [0, 0, 1, 1], [], []>} : vector<152x32xbf16>, vector<32x32xbf16>, vector<152x32xf32> -> vector<152x32xf32>
    %c0_9 = arith.constant 0 : index
    %c0_10 = arith.constant 0 : index
    %11 = vector.load %arg5[%c0_9, %c0_10] : memref<1x32xf32, #tpu.memory_space<vmem>>, vector<1x32xf32>
    %12 = vector.broadcast %11 : vector<1x32xf32> to vector<152x32xf32>
    %13 = arith.addf %10, %12 : vector<152x32xf32>
    %cst_11 = arith.constant 0.000000e+00 : f32
    %14 = vector.broadcast %cst_11 : f32 to vector<152x32xf32>
    %15 = arith.maximumf %13, %14 : vector<152x32xf32>
    %16 = arith.truncf %15 : vector<152x32xf32> to vector<152x32xbf16>
    %c0_12 = arith.constant 0 : index
    %c0_13 = arith.constant 0 : index
    %17 = vector.load %arg6[%c0_12, %c0_13] : memref<32x24xbf16, #tpu.memory_space<vmem>>, vector<32x24xbf16>
    %cst_14 = arith.constant dense<0.000000e+00> : vector<152x24xf32>
    %18 = tpu.matmul %16, %17, %cst_14 {dimension_numbers = #tpu.dot_dimension_numbers<[1], [0], [0], [1], [0, 0, 1, 1], [], []>} : vector<152x32xbf16>, vector<32x24xbf16>, vector<152x24xf32> -> vector<152x24xf32>
    %c0_15 = arith.constant 0 : index
    %c0_16 = arith.constant 0 : index
    %19 = vector.load %arg7[%c0_15, %c0_16] : memref<1x24xf32, #tpu.memory_space<vmem>>, vector<1x24xf32>
    %20 = vector.broadcast %19 : vector<1x24xf32> to vector<152x24xf32>
    %21 = arith.addf %18, %20 : vector<152x24xf32>
    %c0_17 = arith.constant 0 : index
    %c0_18 = arith.constant 0 : index
    %22 = vector.load %arg8[%c0_17, %c0_18] : memref<152x24xf32, #tpu.memory_space<vmem>>, vector<152x24xf32>
    tpu.vector_store %arg8[%c0_17, %c0_18], %21 {strides = array<i32>} : memref<152x24xf32, #tpu.memory_space<vmem>>, vector<152x24xf32>,
    return
  }
  func.func @transform_0(%arg0: i32) -> (i32, i32) {
    %c0_i32 = arith.constant 0 : i32
    %c0_i32_0 = arith.constant 0 : i32
    return %arg0, %c0_i32 : i32, i32
  }
  func.func @transform_1(%arg0: i32) -> (i32, i32) {
    %c0_i32 = arith.constant 0 : i32
    %c0_i32_0 = arith.constant 0 : i32
    %c0_i32_1 = arith.constant 0 : i32
    return %c0_i32, %c0_i32_0 : i32, i32
  }
  func.func @transform_2(%arg0: i32) -> (i32, i32) {
    %c0_i32 = arith.constant 0 : i32
    %c0_i32_0 = arith.constant 0 : i32
    %c0_i32_1 = arith.constant 0 : i32
    return %c0_i32, %c0_i32_0 : i32, i32
  }
  func.func @transform_3(%arg0: i32) -> (i32, i32) {
    %c0_i32 = arith.constant 0 : i32
    %c0_i32_0 = arith.constant 0 : i32
    %c0_i32_1 = arith.constant 0 : i32
    return %c0_i32, %c0_i32_0 : i32, i32
  }
  func.func @transform_4(%arg0: i32) -> (i32, i32) {
    %c0_i32 = arith.constant 0 : i32
    %c0_i32_0 = arith.constant 0 : i32
    %c0_i32_1 = arith.constant 0 : i32
    return %c0_i32, %c0_i32_0 : i32, i32
  }
  func.func @transform_5(%arg0: i32) -> (i32, i32) {
    %c0_i32 = arith.constant 0 : i32
    %c0_i32_0 = arith.constant 0 : i32
    %c0_i32_1 = arith.constant 0 : i32
    return %c0_i32, %c0_i32_0 : i32, i32
  }
  func.func @transform_6(%arg0: i32) -> (i32, i32) {
    %c0_i32 = arith.constant 0 : i32
    %c0_i32_0 = arith.constant 0 : i32
    %c0_i32_1 = arith.constant 0 : i32
    return %c0_i32, %c0_i32_0 : i32, i32
  }
  func.func @transform_7(%arg0: i32) -> (i32, i32) {
    %c0_i32 = arith.constant 0 : i32
    %c0_i32_0 = arith.constant 0 : i32
    return %arg0, %c0_i32 : i32, i32
  }
}

</mosaic_0001>

<bundles_post_ra>
// kernel: mapping_layers_forward.1
= control target key start
LH: loop header
LB: loop body
LE: loop exit
PB: predicated region body
PF: predicated region fallthrough
CT: control target
= control target key end

     0   :  { %s1208_s24 = smov 0   ;;  %s1365_s0 = inlined_call_operand.vmem [shape: bf16[304,16], index: 0, kind: input, shape index: {}]   ;;  %s1366_s1 = inlined_call_operand.vmem [shape: bf16[16,32], index: 1, kind: input, shape index: {}]   ;;  %s1367_s2 = inlined_call_operand.vmem [shape: f32[1,32], index: 2, kind: input, shape index: {}]   ;;  %s1368_s3 = inlined_call_operand.vmem [shape: bf16[32,32], index: 3, kind: input, shape index: {}]   ;;  %s1369_s4 = inlined_call_operand.vmem [shape: f32[1,32], index: 4, kind: input, shape index: {}]   ;;  %s1370_s5 = inlined_call_operand.vmem [shape: bf16[32,24], index: 5, kind: input, shape index: {}]   ;;  %s1371_s6 = inlined_call_operand.vmem [shape: f32[1,24], index: 6, kind: input, shape index: {}]   ;;  %s1372_s7 = inlined_call_operand.vmem [shape: f32[304,24], index: 7, kind: output, shape index: {}]  }
   0x1 LB: > { %s973_s25 = sadd.s32 4294967295, %s1166_s24   ;;  %p977_p0 = scmp.ge.s32.totalorder %s1166_s24, 1  ;;  %s1166_s24 = sphi %s1208_s24, %s17_s24  }
   0x2   : > { %p238_p1 = scmp.lt.s32.totalorder %s1166_s24, 3 }
   0x4   : > { %p239_p2 = pnand %p977_p0, %p238_p1 }
   0x5   : > { %v1145_v0 = vld [vmem:[%s1366_s1] sm:$0xff] (!%p239_p2)   ;;  %s270_s28 = smul.u32 (!%p239_p2), 19, %s973_s25  ;;  %vm365_vm0 = vcmask (!%p239_p2), 130048   ;;  %v1157_v12 = vld [vmem:[%s1368_s3 + $0x8] sm:$0xff] (!%p239_p2)   ;;  %vm560_vm1 = vcmask (!%p239_p2), 261120   ;;  %vm897_vm2 = vcmask (!%p239_p2), 195584  }
   0x6   : > { %242 = sbr.rel (%p239_p2) target bundleno = 712 (0x2c8), region = 48  ;;  %v1156_v1 = vld [vmem:[%s1368_s3] sm:$0xff] (!%p239_p2)   ;;  %1065 = vmatprep.subr.bf16.mxu0 (!%p239_p2), %v1145_v0  ;;  %1135 = vmatprep.subr.bf16.mxu1 (!%p239_p2), %v1145_v0  ;;  %v1159_v14 = vld [vmem:[%s1370_s5 + $0x8] sm:$0xff] (!%p239_p2)  }
   0x7   : > { %p271_p3 = scmp.lt.s32.totalorder (!%p239_p2), %s270_s28, 37  ;;  %1066 = vmatpush3.bf16.msra.mxu0 (!%p239_p2), %v1145_v0  ;;  %1136 = vmatpush3.bf16.msra.mxu1 (!%p239_p2), %v1145_v0  ;;  %v1158_v13 = vld [vmem:[%s1370_s5] sm:$0xff] (!%p239_p2)  }
   0x8   : > { %1087 = vmatprep.subr.bf16.mxu1 (!%p239_p2), %v1156_v1  ;;  %1111 = vmatprep.subr.bf16.mxu0 (!%p239_p2), %v1158_v13  ;;  %v1250_v15 = vld [vmem:[%s1367_s2] ss:$0 sm:$0xff] (!%p239_p2) }
   0xd   : > { %s1374_s28 = smov (!%p271_p3, %s270_s28), 37 }
   0xe   : > { %s978_s8 = sshll.u32 %s1374_s28, 2  ;;  %s979_s22 = sshll.u32 %s1374_s28, 3 }
   0xf   : > { %s274_s11 = scalar_lea.vmem %s1365_s0, %s978_s8  ;;  %s1322_s29 = scalar_lea.vmem %s1372_s7, %s979_s22 }
  0x10   : > { %v1146_v2 = vld [vmem:[%s274_s11] sm:$0xff]   ;;  %v1147_v3 = vld [vmem:[%s274_s11 + $0x8] sm:$0xff]   ;;  %v1148_v4 = vld [vmem:[%s274_s11 + $0x10] sm:$0xff]  }
  0x11   : > { %1067 = vmatprep.mubr.msk.bf16.mxu0 %vm365_vm0, %v1146_v2  ;;  %v1149_v5 = vld [vmem:[%s274_s11 + $0x18] sm:$0xff]   ;;  %v1150_v6 = vld [vmem:[%s274_s11 + $0x20] sm:$0xff]   ;;  %v1152_v7 = vld [vmem:[%s274_s11 + $0x30] sm:$0xff]  }
  0x12   : > { %1068 = vmatmul.mubr.msk.bf16.vlgmr.msra.gmra.mrb[0].mxu0 %vm365_vm0, %v1147_v3  ;;  %v1153_v8 = vld [vmem:[%s274_s11 + $0x38] sm:$0xff]   ;;  %1079 = vmatprep.mubr.msk.bf16.mxu1 %vm365_vm0, %v1152_v7  ;;  %v1154_v9 = vld [vmem:[%s274_s11 + $0x40] sm:$0xff]   ;;  %v1155_v10 = vld [vmem:[%s274_s11 + $0x48] ss:$0 sps:$4 sm:$0xff]  }
  0x13   : > { %1071 = vmatprep.mubr.msk.bf16.mxu0 %vm365_vm0, %v1148_v4  ;;  %1080 = vmatmul.mubr.msk.bf16.vlgmr.msra.gmra.mrb[0].mxu1 %vm365_vm0, %v1153_v8  ;;  %v1151_v11 = vld [vmem:[%s274_s11 + $0x28] sm:$0xff]  }
  0x14   : > { %1083 = vmatprep.mubr.msk.bf16.mxu1 %vm365_vm0, %v1154_v9  ;;  %1088 = vmatpush3.bf16.msra.mxu1 %v1156_v1 }
  0x15   : > { %1089 = vmatprep.subr.bf16.mxu1 %v1157_v12  ;;  %1112 = vmatpush3.bf16.msra.mxu0 %v1158_v13 }
  0x16   : > { %1113 = vmatprep.subr.bf16.mxu0 %v1159_v14 }
  0x18   : > { %1090 = vmatpush3.bf16.msra.mxu1 %v1157_v12 }
  0x19   : > { %1114 = vmatpush3.bf16.msra.mxu0 %v1159_v14 }
  0x1a   : > { %1072 = vmatmul.mubr.msk.bf16.gmra.mrb[4].mxu0 %vm365_vm0, %v1149_v5 }
  0x1b   : > { %1075 = vmatprep.mubr.msk.bf16.mxu0 %vm365_vm0, %v1150_v6  ;;  %1084 = vmatmul.mubr.msk.bf16.gmra.mrb[4].mxu1 %vm365_vm0, %v1155_v10 }
  0x22   : > { %1076 = vmatmul.mubr.msk.bf16.gmra.mrb[8].mxu0 %vm365_vm0, %v1151_v11 }
  0xe5   : > { %v1069_v16 = vpop.f32.mrb[0].mxu0 }
  0xe6   : > { %v439_v17 = vadd.f32 %v1069_v16, %v1250_v15  ;;  %v430_v18 = vpop.f32.mrb[1].mxu0  ;;  %v1081_v28 = vpop.f32.mrb[0].mxu1 }
  0xe7   : > { %v431_v19 = vadd.f32 %v1250_v15, %v430_v18  ;;  %v1070_v20 = vpop.f32.mrb[2].mxu0  ;;  %v487_v30 = vadd.f32 %v1081_v28, %v1250_v15  ;;  %v478_v31 = vpop.f32.mrb[1].mxu1 }
  0xe8   : > { %v442_v21 = vadd.f32 %v1070_v20, %v1250_v15  ;;  %v433_v22 = vpop.f32.mrb[3].mxu0  ;;  %v510_v24 = vmax.f32 %v439_v17, 0.0  ;;  %v479_v34 = vadd.f32 %v1250_v15, %v478_v31  ;;  %v1082_v35 = vpop.f32.mrb[2].mxu1 }
  0xe9   : > { %v434_v23 = vadd.f32 %v1250_v15, %v433_v22  ;;  %v508_v26 = vmax.f32 %v431_v19, 0.0  ;;  %v522_v38 = vmax.f32 %v487_v30, 0.0  ;;  %v490_v39 = vadd.f32 %v1082_v35, %v1250_v15  ;;  %v481_v40 = vpop.f32.mrb[3].mxu1 }
  0xea   : > { %v511_v25 = vmax.f32 %v442_v21, 0.0  ;;  %v520_v43 = vmax.f32 %v479_v34, 0.0  ;;  %v482_v44 = vadd.f32 %v1250_v15, %v481_v40  ;;  %v1284_v21 = vld [vmem:[%s1369_s4] ss:$0 sm:$0xff] }
  0xeb   : > { %v509_v27 = vmax.f32 %v434_v23, 0.0  ;;  %v523_v47 = vmax.f32 %v490_v39, 0.0 }
  0xec   : > { %v528_v29 = vpack.c.bf16 %v511_v25, %v510_v24  ;;  %v521_v49 = vmax.f32 %v482_v44, 0.0 }
  0xed   : > { %v527_v32 = vpack.c.bf16 %v509_v27, %v508_v26  ;;  %v1073_v33 = vpop.f32.mrb[4].mxu0  ;;  %v534_v52 = vpack.c.bf16 %v523_v47, %v522_v38 }
  0xee   : > { %v455_v36 = vadd.f32 %v1073_v33, %v1250_v15  ;;  %v446_v37 = vpop.f32.mrb[5].mxu0  ;;  %v533_v55 = vpack.c.bf16 %v521_v49, %v520_v43  ;;  %v1085_v56 = vpop.f32.mrb[4].mxu1 }
  0xef   : > { %v447_v41 = vadd.f32 %v1250_v15, %v446_v37  ;;  %v1074_v42 = vpop.f32.mrb[6].mxu0  ;;  %1091 = vmatprep.mubr.msk.bf16.mxu1 %vm560_vm1, %v527_v32  ;;  %v494_v58 = vpop.f32.mrb[5].mxu1  ;;  %v503_v18 = vadd.f32 %v1085_v56, %v1250_v15 }
  0xf0   : > { %v458_v45 = vadd.f32 %v1074_v42, %v1250_v15  ;;  %v449_v46 = vpop.f32.mrb[7].mxu0  ;;  %1092 = vmatmul.mubr.msk.bf16.vlgmr.msra.gmra.mrb[8].mxu1 %vm560_vm1, %v528_v29  ;;  %v514_v50 = vmax.f32 %v455_v36, 0.0  ;;  %v495_v61 = vadd.f32 %v1250_v15, %v494_v58  ;;  %v1086_v62 = vpop.f32.mrb[6].mxu1 }
  0xf1   : > { %v450_v48 = vadd.f32 %v1250_v15, %v449_v46  ;;  %v512_v53 = vmax.f32 %v447_v41, 0.0  ;;  %v497_v1 = vpop.f32.mrb[7].mxu1  ;;  %v526_v19 = vmax.f32 %v503_v18, 0.0 }
  0xf2   : > { %v515_v51 = vmax.f32 %v458_v45, 0.0  ;;  %v524_v4 = vmax.f32 %v495_v61, 0.0  ;;  %v498_v5 = vadd.f32 %v1250_v15, %v497_v1 }
  0xf3   : > { %v513_v54 = vmax.f32 %v450_v48, 0.0  ;;  %v536_v20 = vpack.c.bf16 %v526_v19, %v526_v19 }
  0xf4   : > { %v530_v57 = vpack.c.bf16 %v515_v51, %v514_v50  ;;  %v525_v9 = vmax.f32 %v498_v5, 0.0 }
  0xf5   : > { %v529_v59 = vpack.c.bf16 %v513_v54, %v512_v53  ;;  %v1077_v60 = vpop.f32.mrb[8].mxu0 }
  0xf6   : > { %v471_v63 = vadd.f32 %v1077_v60, %v1250_v15  ;;  %v462_v0 = vpop.f32.mrb[9].mxu0  ;;  %v535_v14 = vpack.c.bf16 %v525_v9, %v524_v4 }
  0xf7   : > { %v463_v2 = vadd.f32 %v1250_v15, %v462_v0  ;;  %v1078_v3 = vpop.f32.mrb[10].mxu0  ;;  %1095 = vmatprep.mubr.msk.bf16.mxu1 %vm560_vm1, %v529_v59 }
  0xf8   : > { %v474_v6 = vadd.f32 %v1078_v3, %v1250_v15  ;;  %v465_v7 = vpop.f32.mrb[11].mxu0  ;;  %1096 = vmatmul.mubr.msk.bf16.gmra.mrb[12].mxu1 %vm560_vm1, %v530_v57  ;;  %v518_v10 = vmax.f32 %v471_v63, 0.0 }
  0xf9   : > { %v466_v8 = vadd.f32 %v1250_v15, %v465_v7  ;;  %v516_v12 = vmax.f32 %v463_v2, 0.0 }
  0xfa   : > { %v519_v11 = vmax.f32 %v474_v6, 0.0 }
  0xfb   : > { %v517_v13 = vmax.f32 %v466_v8, 0.0 }
  0xfc   : > { %v532_v16 = vpack.c.bf16 %v519_v11, %v518_v10 }
  0xfd   : > { %v531_v17 = vpack.c.bf16 %v517_v13, %v516_v12 }
  0xff   : > { %1099 = vmatprep.mubr.msk.bf16.mxu1 %vm560_vm1, %v531_v17 }
 0x100   : > { %1100 = vmatmul.mubr.msk.bf16.gmra.mrb[16].mxu1 %vm560_vm1, %v532_v16 }
 0x101   : > { %1103 = vmatprep.mubr.msk.bf16.mxu1 %vm560_vm1, %v533_v55 }
 0x108   : > { %1104 = vmatmul.mubr.msk.bf16.gmra.mrb[20].mxu1 %vm560_vm1, %v534_v52 }
 0x109   : > { %1107 = vmatprep.mubr.msk.bf16.mxu1 %vm560_vm1, %v535_v14 }
 0x110   : > { %1108 = vmatmul.mubr.msk.bf16.gmra.mrb[24].mxu1 %vm560_vm1, %v536_v20 }
 0x1c3   : > { %v1093_v22 = vpop.f32.mrb[8].mxu1 }
 0x1c4   : > { %v634_v23 = vadd.f32 %v1093_v22, %v1284_v21  ;;  %v625_v24 = vpop.f32.mrb[9].mxu1 }
 0x1c5   : > { %v626_v25 = vadd.f32 %v1284_v21, %v625_v24  ;;  %v1094_v15 = vpop.f32.mrb[10].mxu1 }
 0x1c6   : > { %v637_v26 = vadd.f32 %v1094_v15, %v1284_v21  ;;  %v628_v27 = vpop.f32.mrb[11].mxu1  ;;  %v705_v29 = vmax.f32 %v634_v23, 0.0 }
 0x1c7   : > { %v629_v28 = vadd.f32 %v1284_v21, %v628_v27  ;;  %v703_v31 = vmax.f32 %v626_v25, 0.0 }
 0x1c8   : > { %v706_v30 = vmax.f32 %v637_v26, 0.0  ;;  %v1015_v26 = vld [vmem:[%s1371_s6] ss:$0 sm:$0xff] }
 0x1c9   : > { %v704_v32 = vmax.f32 %v629_v28, 0.0 }
 0x1ca   : > { %v723_v33 = vpack.c.bf16 %v706_v30, %v705_v29 }
 0x1cb   : > { %v722_v34 = vpack.c.bf16 %v704_v32, %v703_v31  ;;  %v1097_v35 = vpop.f32.mrb[12].mxu1 }
 0x1cc   : > { %v650_v36 = vadd.f32 %v1097_v35, %v1284_v21  ;;  %v641_v37 = vpop.f32.mrb[13].mxu1 }
 0x1cd   : > { %v642_v38 = vadd.f32 %v1284_v21, %v641_v37  ;;  %v1098_v39 = vpop.f32.mrb[14].mxu1  ;;  %1115 = vmatprep.mubr.msk.bf16.mxu0 %vm560_vm1, %v722_v34 }
 0x1ce   : > { %v653_v40 = vadd.f32 %v1098_v39, %v1284_v21  ;;  %v644_v41 = vpop.f32.mrb[15].mxu1  ;;  %1116 = vmatmul.mubr.msk.bf16.vlgmr.msra.gmra.mrb[12].mxu0 %vm560_vm1, %v723_v33  ;;  %v709_v43 = vmax.f32 %v650_v36, 0.0 }
 0x1cf   : > { %v645_v42 = vadd.f32 %v1284_v21, %v644_v41  ;;  %v707_v45 = vmax.f32 %v642_v38, 0.0 }
 0x1d0   : > { %v710_v44 = vmax.f32 %v653_v40, 0.0 }
 0x1d1   : > { %v708_v46 = vmax.f32 %v645_v42, 0.0 }
 0x1d2   : > { %v725_v47 = vpack.c.bf16 %v710_v44, %v709_v43 }
 0x1d3   : > { %v724_v48 = vpack.c.bf16 %v708_v46, %v707_v45  ;;  %v1101_v49 = vpop.f32.mrb[16].mxu1 }
 0x1d4   : > { %v666_v50 = vadd.f32 %v1101_v49, %v1284_v21  ;;  %v657_v51 = vpop.f32.mrb[17].mxu1 }
 0x1d5   : > { %v658_v52 = vadd.f32 %v1284_v21, %v657_v51  ;;  %v1102_v53 = vpop.f32.mrb[18].mxu1  ;;  %1119 = vmatprep.mubr.msk.bf16.mxu0 %vm560_vm1, %v724_v48 }
 0x1d6   : > { %v669_v54 = vadd.f32 %v1102_v53, %v1284_v21  ;;  %v660_v55 = vpop.f32.mrb[19].mxu1  ;;  %1120 = vmatmul.mubr.msk.bf16.gmra.mrb[16].mxu0 %vm560_vm1, %v725_v47  ;;  %v713_v57 = vmax.f32 %v666_v50, 0.0 }
 0x1d7   : > { %v661_v56 = vadd.f32 %v1284_v21, %v660_v55  ;;  %v711_v59 = vmax.f32 %v658_v52, 0.0 }
 0x1d8   : > { %v714_v58 = vmax.f32 %v669_v54, 0.0 }
 0x1d9   : > { %v712_v60 = vmax.f32 %v661_v56, 0.0 }
 0x1da   : > { %v727_v61 = vpack.c.bf16 %v714_v58, %v713_v57 }
 0x1db   : > { %v726_v62 = vpack.c.bf16 %v712_v60, %v711_v59  ;;  %v1105_v63 = vpop.f32.mrb[20].mxu1 }
 0x1dc   : > { %v682_v0 = vadd.f32 %v1105_v63, %v1284_v21  ;;  %v673_v1 = vpop.f32.mrb[21].mxu1 }
 0x1dd   : > { %v674_v2 = vadd.f32 %v1284_v21, %v673_v1  ;;  %v1106_v3 = vpop.f32.mrb[22].mxu1  ;;  %1123 = vmatprep.mubr.msk.bf16.mxu0 %vm560_vm1, %v726_v62 }
 0x1de   : > { %v685_v4 = vadd.f32 %v1106_v3, %v1284_v21  ;;  %v676_v5 = vpop.f32.mrb[23].mxu1  ;;  %1124 = vmatmul.mubr.msk.bf16.gmra.mrb[20].mxu0 %vm560_vm1, %v727_v61  ;;  %v717_v7 = vmax.f32 %v682_v0, 0.0 }
 0x1df   : > { %v677_v6 = vadd.f32 %v1284_v21, %v676_v5  ;;  %v715_v9 = vmax.f32 %v674_v2, 0.0 }
 0x1e0   : > { %v718_v8 = vmax.f32 %v685_v4, 0.0 }
 0x1e1   : > { %v716_v10 = vmax.f32 %v677_v6, 0.0 }
 0x1e2   : > { %v729_v11 = vpack.c.bf16 %v718_v8, %v717_v7 }
 0x1e3   : > { %v728_v12 = vpack.c.bf16 %v716_v10, %v715_v9  ;;  %v1109_v13 = vpop.f32.mrb[24].mxu1 }
 0x1e4   : > { %v698_v14 = vadd.f32 %v1109_v13, %v1284_v21  ;;  %v689_v16 = vpop.f32.mrb[25].mxu1 }
 0x1e5   : > { %v690_v17 = vadd.f32 %v1284_v21, %v689_v16  ;;  %v1110_v18 = vpop.f32.mrb[26].mxu1  ;;  %1127 = vmatprep.mubr.msk.bf16.mxu0 %vm560_vm1, %v728_v12 }
 0x1e6   : > { %v692_v19 = vpop.f32.mrb[27].mxu1  ;;  %1128 = vmatmul.mubr.msk.bf16.gmra.mrb[24].mxu0 %vm560_vm1, %v729_v11  ;;  %v721_v22 = vmax.f32 %v698_v14, 0.0 }
 0x1e7   : > { %v693_v20 = vadd.f32 %v1284_v21, %v692_v19  ;;  %v719_v23 = vmax.f32 %v690_v17, 0.0 }
 0x1e8   : > { %v731_v15 = vpack.c.bf16 %v721_v22, %v721_v22 }
 0x1e9   : > { %v720_v24 = vmax.f32 %v693_v20, 0.0 }
 0x1eb   : > { %v730_v25 = vpack.c.bf16 %v720_v24, %v719_v23 }
 0x1ed   : > { %1131 = vmatprep.mubr.msk.bf16.mxu0 %vm560_vm1, %v730_v25 }
 0x1ee   : > { %1132 = vmatmul.mubr.msk.bf16.gmra.mrb[28].mxu0 %vm560_vm1, %v731_v15 }
 0x2a1   : > { %v1117_v21 = vpop.f32.mrb[12].mxu0 }
 0x2a2   : > { %v828_v27 = vadd.f32 %v1117_v21, %v1015_v26  ;;  %v819_v28 = vpop.f32.mrb[13].mxu0 }
 0x2a3   : > { %v820_v29 = vadd.f32 %v1015_v26, %v819_v28  ;;  %v1118_v30 = vpop.f32.mrb[14].mxu0 }
 0x2a4   : > { %900 = vst.msk [vmem:[%s1322_s29 + $0x10] sm:$0xff] %vm897_vm2, %v828_v27  ;;  %v831_v31 = vadd.f32 %v1118_v30, %v1015_v26  ;;  %v822_v32 = vpop.f32.mrb[15].mxu0 }
 0x2a5   : > { %898 = vst.msk [vmem:[%s1322_s29] sm:$0xff] %vm897_vm2, %v820_v29  ;;  %v823_v33 = vadd.f32 %v1015_v26, %v822_v32 }
 0x2a6   : > { %901 = vst.msk [vmem:[%s1322_s29 + $0x18] sm:$0xff] %vm897_vm2, %v831_v31 }
 0x2a7   : > { %899 = vst.msk [vmem:[%s1322_s29 + $0x8] sm:$0xff] %vm897_vm2, %v823_v33 }
 0x2a9   : > { %v1121_v34 = vpop.f32.mrb[16].mxu0 }
 0x2aa   : > { %v844_v35 = vadd.f32 %v1121_v34, %v1015_v26  ;;  %v835_v36 = vpop.f32.mrb[17].mxu0 }
 0x2ab   : > { %v836_v37 = vadd.f32 %v1015_v26, %v835_v36  ;;  %v1122_v38 = vpop.f32.mrb[18].mxu0 }
 0x2ac   : > { %904 = vst.msk [vmem:[%s1322_s29 + $0x30] sm:$0xff] %vm897_vm2, %v844_v35  ;;  %v847_v39 = vadd.f32 %v1122_v38, %v1015_v26  ;;  %v838_v40 = vpop.f32.mrb[19].mxu0 }
 0x2ad   : > { %902 = vst.msk [vmem:[%s1322_s29 + $0x20] sm:$0xff] %vm897_vm2, %v836_v37  ;;  %v839_v41 = vadd.f32 %v1015_v26, %v838_v40 }
 0x2ae   : > { %905 = vst.msk [vmem:[%s1322_s29 + $0x38] sm:$0xff] %vm897_vm2, %v847_v39 }
 0x2af   : > { %903 = vst.msk [vmem:[%s1322_s29 + $0x28] sm:$0xff] %vm897_vm2, %v839_v41 }
 0x2b1   : > { %v1125_v42 = vpop.f32.mrb[20].mxu0 }
 0x2b2   : > { %v860_v43 = vadd.f32 %v1125_v42, %v1015_v26  ;;  %v851_v44 = vpop.f32.mrb[21].mxu0 }
 0x2b3   : > { %v852_v45 = vadd.f32 %v1015_v26, %v851_v44  ;;  %v1126_v46 = vpop.f32.mrb[22].mxu0 }
 0x2b4   : > { %908 = vst.msk [vmem:[%s1322_s29 + $0x50] sm:$0xff] %vm897_vm2, %v860_v43  ;;  %v863_v47 = vadd.f32 %v1126_v46, %v1015_v26  ;;  %v854_v48 = vpop.f32.mrb[23].mxu0 }
 0x2b5   : > { %906 = vst.msk [vmem:[%s1322_s29 + $0x40] sm:$0xff] %vm897_vm2, %v852_v45  ;;  %v855_v49 = vadd.f32 %v1015_v26, %v854_v48 }
 0x2b6   : > { %909 = vst.msk [vmem:[%s1322_s29 + $0x58] sm:$0xff] %vm897_vm2, %v863_v47 }
 0x2b7   : > { %907 = vst.msk [vmem:[%s1322_s29 + $0x48] sm:$0xff] %vm897_vm2, %v855_v49 }
 0x2b9   : > { %v1129_v50 = vpop.f32.mrb[24].mxu0 }
 0x2ba   : > { %v876_v51 = vadd.f32 %v1129_v50, %v1015_v26  ;;  %v867_v52 = vpop.f32.mrb[25].mxu0 }
 0x2bb   : > { %v868_v53 = vadd.f32 %v1015_v26, %v867_v52  ;;  %v1130_v54 = vpop.f32.mrb[26].mxu0 }
 0x2bc   : > { %912 = vst.msk [vmem:[%s1322_s29 + $0x70] sm:$0xff] %vm897_vm2, %v876_v51  ;;  %v879_v55 = vadd.f32 %v1130_v54, %v1015_v26  ;;  %v870_v56 = vpop.f32.mrb[27].mxu0 }
 0x2bd   : > { %910 = vst.msk [vmem:[%s1322_s29 + $0x60] sm:$0xff] %vm897_vm2, %v868_v53  ;;  %v871_v57 = vadd.f32 %v1015_v26, %v870_v56 }
 0x2be   : > { %913 = vst.msk [vmem:[%s1322_s29 + $0x78] sm:$0xff] %vm897_vm2, %v879_v55 }
 0x2bf   : > { %911 = vst.msk [vmem:[%s1322_s29 + $0x68] sm:$0xff] %vm897_vm2, %v871_v57 }
 0x2c1   : > { %v1133_v58 = vpop.f32.mrb[28].mxu0 }
 0x2c2   : > { %v892_v59 = vadd.f32 %v1133_v58, %v1015_v26  ;;  %v883_v60 = vpop.f32.mrb[29].mxu0 }
 0x2c3   : > { %v884_v61 = vadd.f32 %v1015_v26, %v883_v60  ;;  %v1134_v62 = vpop.f32.mrb[30].mxu0 }
 0x2c4   : > { %916 = vst.msk [vmem:[%s1322_s29 + $0x90] sm:$0xff] %vm897_vm2, %v892_v59  ;;  %v886_v63 = vpop.f32.mrb[31].mxu0 }
 0x2c5   : > { %914 = vst.msk [vmem:[%s1322_s29 + $0x80] sm:$0xff] %vm897_vm2, %v884_v61  ;;  %v887_v0 = vadd.f32 %v1015_v26, %v886_v63 }
 0x2c7   : > { %915 = vst.msk [vmem:[%s1322_s29 + $0x88] sm:$0xff] %vm897_vm2, %v887_v0 }
 0x2c8 PF: > { %s17_s24 = sadd.s32 1, %s1166_s24  }
 0x2c9   : > { %p14_p4 = scmp.ge.s32.totalorder %s17_s24, 4  }
 0x2cb   :  { %16 = sbr.rel (!%p14_p4) target bundleno = 1 (0x1), region = 78 }

</bundles_post_ra>
